<compile_context>
chip_gen: v5e
topology: v5e:2x2
jax: 0.10.0
libtpu: 0.0.40
codegen_flags: <defaults>
</compile_context>

<pallas_src>
import functools

import jax
import jax.numpy as jnp
from jax.experimental import pallas as pl
from jax.experimental.pallas import tpu as pltpu


DROPOUT_P = 0.5


def _dropout_keep_mask(key, shape, dtype):
    """Bernoulli(keep = 1 - p) mask as {0, 1} values of `dtype`."""
    return jax.random.bernoulli(key, p=1.0 - DROPOUT_P, shape=shape).astype(dtype)


def _classifier_kernel(apply_dropout, compute_dtype, *refs):
    """Tiled y = dropout(x) @ W^T with W kept in (n_classes, feature_dim) layout.

    refs (training):  x_ref (tm, tk), mask_ref (tm, tk), w_ref (tn, tk),
                      o_ref (tm, tn), acc_ref (tm, tn) f32 scratch
    refs (eval):      x_ref, w_ref, o_ref, acc_ref
    """
    if apply_dropout:
        x_ref, m_ref, w_ref, o_ref, acc_ref = refs
    else:
        x_ref, w_ref, o_ref, acc_ref = refs

    k = pl.program_id(2)

    @pl.when(k == 0)
    def _init():
        acc_ref[...] = jnp.zeros_like(acc_ref)

    xv = x_ref[...]
    if apply_dropout:
        # Zero the dropped activations here; the 1/(1-p) rescale is folded into
        # the (tm, tn) output tile at finalize time (cheaper than scaling B*F).
        xv = xv * m_ref[...]

    xv = xv.astype(compute_dtype)
    wv = w_ref[...].astype(compute_dtype)

    # Contract x:(tm, tk) with w:(tn, tk) over the feature axis of both ->
    # (tm, tn).  MXU consumes the PyTorch-layout weight without a transpose.
    acc_ref[...] += jax.lax.dot_general(
        xv,
        wv,
        dimension_numbers=(((1,), (1,)), ((), ())),
        preferred_element_type=jnp.float32,
    )

    @pl.when(k == pl.num_programs(2) - 1)
    def _finalize():
        out = acc_ref[...]
        if apply_dropout:
            out = out * (1.0 / (1.0 - DROPOUT_P))
        o_ref[...] = out.astype(o_ref.dtype)


def classifier_forward(
    x,
    weight,
    *,
    training=False,
    dropout_key=None,
    compute_dtype=None,
    tm=None,
    tn=None,
    tk=None,
):
    """Forward pass of Classifier.

    x:      (B, feature_dim)
    weight: (n_classes, feature_dim)  -- PyTorch nn.Linear layout, NOT transposed.
    Returns (B, n_classes) in x.dtype.
    """
    B, Fdim = x.shape
    C, Fw = weight.shape
    assert Fw == Fdim, "weight feature dim mismatch"
    if compute_dtype is None:
        compute_dtype = x.dtype

    # Tile sizes.  Defaults are sized for the toy shapes; for large problems
    # keep tn/tk multiples of 128 (256 on v6e/v7x) and budget f32 tiles well
    # under v7x's 64 MiB physical VMEM.
    tm = min(B, 256) if tm is None else min(tm, B)
    tn = min(C, 256) if tn is None else min(tn, C)
    tk = min(Fdim, 512) if tk is None else min(tk, Fdim)
    assert B % tm == 0 and C % tn == 0 and Fdim % tk == 0, (
        "this wrapper assumes tile-divisible shapes"
    )

    grid = (B // tm, C // tn, Fdim // tk)

    x_spec = pl.BlockSpec((tm, tk), lambda i, j, k: (i, k))
    w_spec = pl.BlockSpec((tn, tk), lambda i, j, k: (j, k))
    o_spec = pl.BlockSpec((tm, tn), lambda i, j, k: (i, j))

    if training:
        if dropout_key is None:
            raise ValueError("training=True requires dropout_key")
        mask = _dropout_keep_mask(dropout_key, x.shape, x.dtype)
        operands = (x, mask, weight)
        in_specs = [x_spec, x_spec, w_spec]  # mask is tiled exactly like x
    else:
        operands = (x, weight)
        in_specs = [x_spec, w_spec]

    kernel = functools.partial(_classifier_kernel, training, compute_dtype)

    return pl.pallas_call(
        kernel,
        out_shape=jax.ShapeDtypeStruct((B, C), x.dtype),
        grid_spec=pltpu.PrefetchScalarGridSpec(
            num_scalar_prefetch=0,
            grid=grid,
            in_specs=in_specs,
            out_specs=o_spec,
            scratch_shapes=[pltpu.VMEM((tm, tn), jnp.float32)],
        ),
        compiler_params=pltpu.CompilerParams(
            dimension_semantics=("parallel", "parallel", "arbitrary"),
        ),
    )(*operands)


if __name__ == "__main__":
    batch = 8
    feature_dim = 256
    n_classes = 128

    key = jax.random.PRNGKey(0)
    kx, kw, kd = jax.random.split(key, 3)
    x = jax.random.normal(kx, (batch, feature_dim), dtype=jnp.float32)
    # nn.Linear stores (out_features, in_features); keep that layout.
    weight = (
        jax.random.normal(kw, (n_classes, feature_dim), dtype=jnp.float32)
        * (1.0 / jnp.sqrt(feature_dim))
    )

    # 1) Eval mode (dropout == identity), f32 compute, tk=128 to exercise the
    #    K-accumulation loop.  Exact check against pure JAX.
    y_eval = classifier_forward(x, weight, training=False, tk=128)
    jax.block_until_ready(y_eval)
    y_ref = x @ weight.T
    assert jnp.allclose(y_eval, y_ref, atol=1e-4, rtol=1e-4), "eval-mode mismatch"

    # 2) Eval mode with bf16 operands / f32 accumulation.
    y_bf16 = classifier_forward(
        x, weight, training=False, compute_dtype=jnp.bfloat16, tk=128
    )
    jax.block_until_ready(y_bf16)
    assert jnp.allclose(y_bf16, y_ref, atol=1e-1, rtol=5e-2), "bf16 path mismatch"

    # 3) Training mode: fused dropout(0.5) + matmul.  Reference rebuilds the
    #    same keep mask from the same key.
    y_train = classifier_forward(x, weight, training=True, dropout_key=kd, tk=128)
    jax.block_until_ready(y_train)
    keep = _dropout_keep_mask(kd, x.shape, x.dtype)
    y_train_ref = ((x * keep) @ weight.T) * (1.0 / (1.0 - DROPOUT_P))
    assert jnp.allclose(y_train, y_train_ref, atol=1e-4, rtol=1e-4), (
        "training-mode mismatch"
    )
    assert y_train.shape == (batch, n_classes)

    print("KERNEL_OK")
</pallas_src>

<mosaic_0001>
module attributes {stable_mosaic.version = 11 : i64} {
  func.func @_classifier_kernel(%arg0: i32, %arg1: i32, %arg2: i32, %arg3: memref<8x128xf32, #tpu.memory_space<vmem>>, %arg4: memref<128x128xf32, #tpu.memory_space<vmem>>, %arg5: memref<8x128xf32, #tpu.memory_space<vmem>>, %arg6: memref<8x128xf32, #tpu.memory_space<vmem>>) attributes {dimension_semantics = [#tpu.dimension_semantics<parallel>, #tpu.dimension_semantics<parallel>, #tpu.dimension_semantics<arbitrary>], iteration_bounds = array<i64: 1, 1, 2>, scalar_prefetch = 0 : i64, scratch_operands = 1 : i64, tpu.core_type = #tpu.core_type<tc>, window_params = [{transform_indices = @transform_0, window_bounds = array<i64: 8, 128>}, {transform_indices = @transform_1, window_bounds = array<i64: 128, 128>}, {transform_indices = @transform_2, window_bounds = array<i64: 8, 128>}]} {
    %c0_i32 = arith.constant 0 : i32
    %0 = arith.cmpi eq, %arg2, %c0_i32 : i32
    %1 = arith.extui %0 : i1 to i32
    %c0_i32_0 = arith.constant 0 : i32
    %2 = arith.cmpi ne, %1, %c0_i32_0 : i32
    scf.if %2 {
      %cst_9 = arith.constant 0.000000e+00 : f32
      %12 = vector.broadcast %cst_9 : f32 to vector<8x128xf32>
      %c0_10 = arith.constant 0 : index
      %c0_11 = arith.constant 0 : index
      %13 = vector.load %arg6[%c0_10, %c0_11] : memref<8x128xf32, #tpu.memory_space<vmem>>, vector<8x128xf32>
      tpu.vector_store %arg6[%c0_10, %c0_11], %12 {strides = array<i32>} : memref<8x128xf32, #tpu.memory_space<vmem>>, vector<8x128xf32>,
    } else {
    }
    %c0 = arith.constant 0 : index
    %c0_1 = arith.constant 0 : index
    %3 = vector.load %arg3[%c0, %c0_1] : memref<8x128xf32, #tpu.memory_space<vmem>>, vector<8x128xf32>
    %c0_2 = arith.constant 0 : index
    %c0_3 = arith.constant 0 : index
    %4 = vector.load %arg4[%c0_2, %c0_3] : memref<128x128xf32, #tpu.memory_space<vmem>>, vector<128x128xf32>
    %c0_4 = arith.constant 0 : index
    %c0_5 = arith.constant 0 : index
    %5 = vector.load %arg6[%c0_4, %c0_5] : memref<8x128xf32, #tpu.memory_space<vmem>>, vector<8x128xf32>
    %cst = arith.constant dense<0.000000e+00> : vector<8x128xf32>
    %6 = tpu.matmul %3, %4, %cst {dimension_numbers = #tpu.dot_dimension_numbers<[1], [1], [0], [0], [0, 0, 1, 0], [], []>} : vector<8x128xf32>, vector<128x128xf32>, vector<8x128xf32> -> vector<8x128xf32>
    %7 = arith.addf %5, %6 : vector<8x128xf32>
    %c0_6 = arith.constant 0 : index
    %c0_7 = arith.constant 0 : index
    %8 = vector.load %arg6[%c0_6, %c0_7] : memref<8x128xf32, #tpu.memory_space<vmem>>, vector<8x128xf32>
    tpu.vector_store %arg6[%c0_6, %c0_7], %7 {strides = array<i32>} : memref<8x128xf32, #tpu.memory_space<vmem>>, vector<8x128xf32>,
    %c1_i32 = arith.constant 1 : i32
    %9 = arith.cmpi eq, %arg2, %c1_i32 : i32
    %10 = arith.extui %9 : i1 to i32
    %c0_i32_8 = arith.constant 0 : i32
    %11 = arith.cmpi ne, %10, %c0_i32_8 : i32
    scf.if %11 {
      %c0_9 = arith.constant 0 : index
      %c0_10 = arith.constant 0 : index
      %12 = vector.load %arg6[%c0_9, %c0_10] : memref<8x128xf32, #tpu.memory_space<vmem>>, vector<8x128xf32>
      %c0_11 = arith.constant 0 : index
      %c0_12 = arith.constant 0 : index
      %13 = vector.load %arg5[%c0_11, %c0_12] : memref<8x128xf32, #tpu.memory_space<vmem>>, vector<8x128xf32>
      tpu.vector_store %arg5[%c0_11, %c0_12], %12 {strides = array<i32>} : memref<8x128xf32, #tpu.memory_space<vmem>>, vector<8x128xf32>,
    } else {
    }
    return
  }
  func.func @transform_0(%arg0: i32, %arg1: i32, %arg2: i32) -> (i32, i32) {
    %c0_i32 = arith.constant 0 : i32
    return %arg0, %arg2 : i32, i32
  }
  func.func @transform_1(%arg0: i32, %arg1: i32, %arg2: i32) -> (i32, i32) {
    %c0_i32 = arith.constant 0 : i32
    return %arg1, %arg2 : i32, i32
  }
  func.func @transform_2(%arg0: i32, %arg1: i32, %arg2: i32) -> (i32, i32) {
    %c0_i32 = arith.constant 0 : i32
    return %arg0, %arg1 : i32, i32
  }
}

</mosaic_0001>

<bundles_post_ra>
// kernel: tpu_custom_call.1
= control target key start
LH: loop header
LB: loop body
LE: loop exit
PB: predicated region body
PF: predicated region fallthrough
CT: control target
= control target key end

     0   :  { %7 = vsyncpa [#allocation4], 0  ;;  %s770_s0 = inlined_call_operand.hbm [shape: f32[8,256], index: 0, kind: input, shape index: {}]   ;;  %s771_s1 = inlined_call_operand.hbm [shape: f32[128,256], index: 1, kind: input, shape index: {}]   ;;  %s772_s2 = inlined_call_operand.hbm [shape: f32[8,128], index: 2, kind: output, shape index: {}]  }
   0x1   :  { %9 = vsyncpa [#allocation4 + $0x1], 0 }
   0x2   :  { %10 = vsyncpa [#allocation7], 0 }
   0x3   :  { %12 = vsyncpa [#allocation7 + $0x1], 0 }
   0x4   :  { %13 = vsyncpa [#allocation5], 0  ;;  %s636_s9 = smov 0   ;;  %s638_s10 = smov 0  }
   0x5   :  { %s640_s11 = smov 0   ;;  %s642_s12 = smov 0  }
   0x6   :  { %s644_s13 = smov 0   ;;  %s646_s14 = smov 0  }
   0x7 LB: > { %s381_s15 = sadd.s32 4294967295, %s614_s14   ;;  %s31_s16 = sadd.s32 1, %s610_s13  ;;  %s614_s14 = sphi %s646_s14, %s19_s14   ;;  %s610_s13 = sphi %s644_s13, %s780_s13   ;;  %s606_s12 = sphi %s642_s12, %s779_s12   ;;  %s602_s11 = sphi %s640_s11, %s778_s11   ;;  %s598_s10 = sphi %s638_s10, %s777_s10   ;;  %s594_s9 = sphi %s636_s9, %s776_s9  }
   0x8   : > { %p32_p0 = scmp.ge.s32.totalorder %s31_s16, 2  ;;  %s47_s17 = sadd.s32 1, %s602_s11 }
   0x9   : > { %p54_p1 = scmp.ne.s32.totalorder %s602_s11, %s598_s10  ;;  %p55_p2 = scmp.eq.s32.totalorder %s614_s14, 0 }
   0xa   : > { %s782_s16 = smov (%p32_p0, %s31_s16), 0  ;;  %p60_p4 = scmp.ne.s32.totalorder %s598_s10, %s594_s9 }
   0xb   : > { %p672_p3 = por %p55_p2, %p54_p1  ;;  %s43_s19 = ssub.s32 %s610_s13, %s782_s16 }
   0xc   : > { %p61_p5 = scmp.eq.s32.totalorder %s381_s15, 0  ;;  %p45_p6 = scmp.eq.s32.totalorder %s43_s19, 0 }
   0xd   : > { %p412_p8 = scmp.lt.s32.totalorder %s614_s14, 2  ;;  %s690_s22 = sand.u32 1, %s602_s11  }
   0xe   : > { %p681_p7 = por %p61_p5, %p60_p4  ;;  %s385_s23 = sshll.u32 %s610_s13, 3 }
   0xf   : > { %s687_s21 = scalar_select %p45_p6, %s602_s11, %s47_s17  }
  0x10   : > { %s384_s24 = sshll.u32 %s690_s22, 3  ;;  %s150_s27 = scalar_lea.hbm %s770_s0, %s385_s23 }
  0x11   : > { %s152_s28 = sshll.u32 %s150_s27, 4  ;;  %s144_s29 = scalar_lea.vmem [#allocation3], %s384_s24  ;;  %s153_s28 = int_to_ptr.hbm [resolvable:$true] %s152_s28 }
  0x12   : > { %s154_s30 = sshll.u32 %s144_s29, 4  ;;  %p699_p9 = pnand %p412_p8, %p672_p3  ;;  %s155_s30 = int_to_ptr.vmem [resolvable:$true] %s154_s30 }
  0x13   : > { %s386_s4 = sshll.u32 %s690_s22, 7  ;;  %s172_s7 = scalar_lea.hbm %s771_s1, %s385_s23 }
  0x14   : > { %s141_s8 = scalar_lea.sflag [#allocation4], %s690_s22  ;;  %s173_s9 = sshll.u32 %s172_s7, 4  ;;  %s174_s9 = int_to_ptr.hbm [resolvable:$true] %s173_s9 }
  0x15   : > { %408 = dma.hbm_to_vmem [thread:$0]  (!%p699_p9), %s153_s28, 128, %s155_s30, %s141_s8  }
  0x16   : > { %p388_p10 = scmp.ge.s32.totalorder %s614_s14, 1  ;;  %p183_p11 = scmp.lt.s32.totalorder %s614_s14, 3 }
  0x17   : > { %s165_s17 = scalar_lea.vmem [#allocation6], %s386_s4  ;;  %s162_s19 = scalar_lea.sflag [#allocation7], %s690_s22 }
  0x18   : > { %s175_s18 = sshll.u32 %s165_s17, 4  ;;  %p184_p12 = pnand %p388_p10, %p183_p11  ;;  %s176_s18 = int_to_ptr.vmem [resolvable:$true] %s175_s18 }
  0x19   : > { %s616_s24 = smov 256   ;;  %s617_s25 = smov 128  }
  0x1a   : > { %s618_s26 = smov 8   ;;  %187 = sbr.rel (%p184_p12) target bundleno = 251 (0xfb), region = 28 }
  0x1b   : > { %411 = dma.hbm_to_vmem [thread:$0]  (!%p699_p9), %s174_s9, 2048, %s176_s18, %s162_s19, %s616_s24, %s617_s25, %s618_s26  }
  0x1c   : > { %s189_s23 = sand.u32 (!%p184_p12), 1, %s598_s10  }
  0x1d   : > { %s389_s27 = sshll.u32 (!%p184_p12), %s189_s23, 3  ;;  %s190_s28 = scalar_lea.sflag (!%p184_p12), [#allocation4], %s189_s23 }
  0x1e   : > { %s716_s29 = scalar_lea.vmem (!%p184_p12), [#allocation3], %s389_s27 }
  0x1f   : > { %581 = dma.done.wait (%p681_p7), %s190_s28, 128  }
  0x20   : > { %583 = vsyncadd (%p681_p7), %s190_s28, 4294967168  ;;  %s390_s22 = sshll.u32 %s189_s23, 7  ;;  %s200_s30 = scalar_lea.sflag [#allocation7], %s189_s23 }
  0x21   : > { %s722_s4 = scalar_lea.vmem [#allocation6], %s390_s22 }
  0x22   : > { %585 = dma.done.wait (%p681_p7), %s200_s30, 2048  }
  0x23   : > { %587 = vsyncadd (%p681_p7), %s200_s30, 4294965248  ;;  %p391_p13 = scmp.ne.s32.totalorder %s606_s12, 0 }
  0x25   : > { %229 = sbr.rel (%p391_p13) target bundleno = 44 (0x2c), region = 40 }
  0x2a   : > { %v619_v0 = vmov 0.0  }
  0x2b   : > { %230 = vst [vmem:[#allocation2] sm:$0xff] %v619_v0 }
  0x2c PF: > { %v247_v1 = vld [vmem:[%s722_s4 + $0x78] sm:$0xff]  ;;  %v246_v2 = vld [vmem:[%s722_s4 + $0x70] sm:$0xff]  ;;  %v245_v3 = vld [vmem:[%s722_s4 + $0x68] sm:$0xff]  ;;  %p392_p0 = scmp.ne.s32.totalorder %s606_s12, 1 }
  0x2d   : > { %249 = vmatpush.xpose.msra.mxu0 %v247_v1  ;;  %v244_v4 = vld [vmem:[%s722_s4 + $0x60] sm:$0xff]  ;;  %v243_v5 = vld [vmem:[%s722_s4 + $0x58] sm:$0xff]  ;;  %v242_v6 = vld [vmem:[%s722_s4 + $0x50] sm:$0xff] }
  0x2e   : > { %v241_v7 = vld [vmem:[%s722_s4 + $0x48] sm:$0xff]  ;;  %v240_v8 = vld [vmem:[%s722_s4 + $0x40] sm:$0xff]  ;;  %v239_v9 = vld [vmem:[%s722_s4 + $0x38] sm:$0xff] }
  0x2f   : > { %v238_v10 = vld [vmem:[%s722_s4 + $0x30] sm:$0xff]  ;;  %v237_v11 = vld [vmem:[%s722_s4 + $0x28] sm:$0xff]  ;;  %v236_v12 = vld [vmem:[%s722_s4 + $0x20] sm:$0xff] }
  0x30   : > { %v235_v13 = vld [vmem:[%s722_s4 + $0x18] sm:$0xff]  ;;  %v234_v14 = vld [vmem:[%s722_s4 + $0x10] sm:$0xff]  ;;  %v233_v15 = vld [vmem:[%s722_s4 + $0x8] sm:$0xff] }
  0x31   : > { %250 = vmatpush.xpose.msra.mxu0 %v246_v2  ;;  %v232_v16 = vld [vmem:[%s722_s4] sm:$0xff]  ;;  %v231_v17 = vld [vmem:[%s716_s29] sm:$0xff] }
  0x32   : > { %v248_v18 = vld [vmem:[#allocation2] sm:$0xff] }
  0x35   : > { %251 = vmatpush.xpose.msra.mxu0 %v245_v3 }
  0x39   : > { %252 = vmatpush.xpose.msra.mxu0 %v244_v4 }
  0x3d   : > { %253 = vmatpush.xpose.msra.mxu0 %v243_v5 }
  0x41   : > { %254 = vmatpush.xpose.msra.mxu0 %v242_v6 }
  0x45   : > { %255 = vmatpush.xpose.msra.mxu0 %v241_v7 }
  0x49   : > { %256 = vmatpush.xpose.msra.mxu0 %v240_v8 }
  0x4d   : > { %257 = vmatpush.xpose.msra.mxu0 %v239_v9 }
  0x51   : > { %258 = vmatpush.xpose.msra.mxu0 %v238_v10 }
  0x55   : > { %259 = vmatpush.xpose.msra.mxu0 %v237_v11 }
  0x59   : > { %260 = vmatpush.xpose.msra.mxu0 %v236_v12 }
  0x5d   : > { %261 = vmatpush.xpose.msra.mxu0 %v235_v13 }
  0x61   : > { %262 = vmatpush.xpose.msra.mxu0 %v234_v14 }
  0x65   : > { %263 = vmatpush.xpose.msra.mxu0 %v233_v15 }
  0x69   : > { %264 = vmatpush.xpose.msra.mxu0 %v232_v16 }
  0x6c   : > { %265 = vmatmul.f32.vlgmr.msra.gmra.mxu0 %v231_v17 }
  0xe8   : > { %274 = sbr.rel (%p392_p0) target bundleno = 245 (0xf5), region = 44 }
  0xe9   : > { %v266_v19 = vpop.f32.mrf.mxu0 }
  0xea   : > { %v269_v20 = vadd.f32 %v266_v19, %v248_v18 }
  0xec   : > { %270 = vst [vmem:[#allocation2] sm:$0xff] %v269_v20 }
  0xf3   : > { %v275_v21 = vld [vmem:[#allocation2] sm:$0xff] }
  0xf4   : > { %276 = vst [vmem:[#allocation8] sm:$0xff] %v275_v21 }
  0xf5 PF: > { %p413_p1 = scmp.eq.s32.totalorder %s381_s15, 1  ;;  %s288_s5 = sshll.u32 %s772_s2, 4  ;;  %s289_s5 = int_to_ptr.hbm [resolvable:$true] %s288_s5 }
  0xf6   : > { %s620_s6 = smov [#allocation8]  }
  0xf7   : > { %s286_s7 = sshll.u32 %s620_s6, 4  ;;  %s287_s7 = int_to_ptr.vmem [resolvable:$true] %s286_s7 }
  0xf8   : > { %402 = dma.vmem_to_hbm [thread:$0]  (%p413_p1), %s287_s7, 128, %s289_s5, [#allocation5]  }
  0xf9   : > { %589 = dma.done.wait (%p413_p1), [#allocation5], 128  }
  0xfa   : > { %591 = vsyncadd (%p413_p1), [#allocation5], 4294967168 }
  0xfb PF: > { %s19_s14 = sadd.s32 1, %s614_s14   ;;  %s776_s9 = smov %s598_s10 }
  0xfc   : > { %p16_p2 = scmp.ge.s32.totalorder %s19_s14, 4   ;;  %s777_s10 = smov %s602_s11 }
  0xfd   : > { %s778_s11 = smov %s687_s21  ;;  %s779_s12 = smov %s610_s13 }
  0xfe   : > { %s780_s13 = smov %s782_s16  ;;  %18 = sbr.rel (!%p16_p2) target bundleno = 7 (0x7), region = 87 }
 0x103   :  { %302 = vsyncpa [#allocation4], 1 }
 0x104   :  { %304 = vsyncpa [#allocation4 + $0x1], 1 }
 0x105   :  { %305 = vsyncpa [#allocation7], 1 }
 0x106   :  { %307 = vsyncpa [#allocation7 + $0x1], 1 }
 0x107   :  { %308 = vsyncpa [#allocation5], 1 }
 0x108   :  { %310 = vsyncpa [#allocation5 + $0x1], 1 }

</bundles_post_ra>
